<compile_context>
chip_gen: v7x
topology: tpu7x:2x2x1
jax: 0.10.0
libtpu: 0.0.40
codegen_flags: <defaults>
</compile_context>

<pallas_src>
import functools

import jax
import jax.numpy as jnp
from jax.experimental import pallas as pl
from jax.experimental.pallas import tpu as pltpu


_VMEM_BUDGET_BYTES = 20 * 1024 * 1024          # per-step footprint target
_VMEM_LIMIT_BYTES = 32 * 1024 * 1024           # safe on v5e/v6e/v7x


def _pair(v):
    if isinstance(v, (tuple, list)):
        return int(v[0]), int(v[1])
    return int(v), int(v)


def _round_up(x, m):
    return (x + m - 1) // m * m


def _plane_vmem_bytes(h, w, w_out, sh, itemsize):
    """Rough per-plane VMEM footprint for one grid step (padded to 128 lanes)."""
    lw_in = _round_up(w, 128)
    lw_outblk = _round_up(sh * w_out, 128)
    lw_acc = _round_up(w_out, 128)
    per_row = (
        2 * lw_in * (itemsize + 4)      # double-buffered x + idc blocks
        + 2 * 128 * 4                   # double-buffered row-offset column
        + 2 * lw_outblk * itemsize      # double-buffered output block
        + 6 * lw_in * 4                 # in-kernel temporaries on the input tile
        + 2 * lw_acc * 4                # f32 accumulator + matmul result
    )
    return h * per_row


def _pick_planes(nc, h, plane_bytes, budget):
    """Largest plane count per block that fits VMEM; keep grid >= 2 when possible."""
    divisors = [p for p in range(1, nc + 1) if nc % p == 0]
    shape_ok = [p for p in divisors if (p * h) % 8 == 0 or p == nc]
    if not shape_ok:
        shape_ok = [nc]
    fits = [p for p in shape_ok if p * plane_bytes <= budget] or [min(shape_ok)]
    multi_core = [p for p in fits if nc // p >= 2]     # v7x: 2 TensorCores per chip
    return max(multi_core or fits)


def _max_unpool_kernel(x_ref, idc_ref, rowbase_ref, o_ref, *, sh, sw, w_out):
    x = x_ref[...]                      # (rows, W)   values, input dtype
    idc = idc_ref[...]                  # (rows, W)   int32 flat output indices
    rows, w_in = x.shape

    # Flat output index of each element's window origin:
    #   origin[r, w] = (h * sh) * W_out + w * sw      (h-part precomputed per row)
    w_iota = jax.lax.broadcasted_iota(jnp.int32, (rows, w_in), 1)
    origin = rowbase_ref[...] + w_iota * sw            # (rows, 1) + (rows, W)

    # Static lane-expansion matrices: expand[b][w, o] = 1  iff  o == w*sw + b.
    src = jax.lax.broadcasted_iota(jnp.int32, (w_in, w_out), 0)
    dst = jax.lax.broadcasted_iota(jnp.int32, (w_in, w_out), 1)
    one = jnp.ones((), x.dtype)
    zero = jnp.zeros((), x.dtype)
    expand = [jnp.where(dst == src * sw + b, one, zero) for b in range(sw)]

    for a in range(sh):
        acc = jnp.zeros((rows, w_out), jnp.float32)
        for b in range(sw):
            keep = idc == origin + (a * w_out + b)      # k*k structured compares
            vals = jnp.where(keep, x, zero)             # stays in input dtype
            acc = acc + jnp.dot(vals, expand[b],
                                preferred_element_type=jnp.float32)
        # Row h of this block carries output row h*sh + a at lanes [a*W_out, (a+1)*W_out).
        o_ref[:, pl.ds(a * w_out, w_out)] = acc.astype(o_ref.dtype)


def max_unpool2d(x, idc, kernel_size, stride=2, output_size=None):
    """Pallas equivalent of nn.MaxUnpool2d(kernel_size, stride)(x, idc)."""
    kh, kw = _pair(kernel_size)
    sh, sw = _pair(stride if stride is not None else kernel_size)
    N, C, H, W = x.shape
    if output_size is not None:
        H_out, W_out = int(output_size[-2]), int(output_size[-1])
    else:
        H_out = (H - 1) * sh + kh
        W_out = (W - 1) * sw + kw

    if (kh, kw) != (sh, sw):
        # TODO(synk): overlapping (k > s) / gapped (k < s) unpool windows are not
        # implemented in the Pallas fast path; SegNet uses kernel_size == stride.
        raise NotImplementedError(
            "Pallas max_unpool2d currently requires kernel_size == stride")

    NC = N * C
    R = NC * H
    x2 = x.reshape(R, W)
    idc2 = idc.reshape(R, W).astype(jnp.int32)
    # Per-row flat offset of the window origin row: (h * sh) * W_out with h = row % H.
    rowbase = ((jnp.arange(R, dtype=jnp.int32) % H) * (sh * W_out)).reshape(R, 1)

    itemsize = jnp.dtype(x.dtype).itemsize
    planes = _pick_planes(
        NC, H, _plane_vmem_bytes(H, W, W_out, sh, itemsize), _VMEM_BUDGET_BYTES)
    rows = planes * H
    grid = (NC // planes,)

    out2 = pl.pallas_call(
        functools.partial(_max_unpool_kernel, sh=sh, sw=sw, w_out=W_out),
        out_shape=jax.ShapeDtypeStruct((R, sh * W_out), x.dtype),
        grid_spec=pltpu.PrefetchScalarGridSpec(
            num_scalar_prefetch=0,
            grid=grid,
            in_specs=[
                pl.BlockSpec((rows, W), lambda i: (i, 0)),
                pl.BlockSpec((rows, W), lambda i: (i, 0)),
                pl.BlockSpec((rows, 1), lambda i: (i, 0)),
            ],
            out_specs=pl.BlockSpec((rows, sh * W_out), lambda i: (i, 0)),
        ),
        compiler_params=pltpu.CompilerParams(
            dimension_semantics=("parallel",),
            vmem_limit_bytes=_VMEM_LIMIT_BYTES,
        ),
    )(x2, idc2, rowbase)

    # Free row-major collapse: (R, sh*W_out) == (N, C, H*sh, W_out).
    out = out2.reshape(N, C, H * sh, W_out)
    if H_out > H * sh:        # output_size asked for extra (zero) rows
        out = jnp.pad(out, ((0, 0), (0, 0), (0, H_out - H * sh), (0, 0)))
    elif H_out < H * sh:
        out = out[:, :, :H_out, :]
    return out


class UpSample:
    """JAX/Pallas port of segnet.UpSample (MaxUnpool2d wrapper). No parameters."""

    def __init__(self, kernel_size, stride=2):
        self.kernel_size = kernel_size
        self.stride = stride

    def __call__(self, x, idc, output_size=None):
        return max_unpool2d(x, idc, self.kernel_size,
                            stride=self.stride, output_size=output_size)


if __name__ == "__main__":
    # Pooled input (2, 4, 16, 16) unpools to (2, 4, 32, 32) with kernel_size=2, stride=2.
    N, C, H, W = 2, 4, 16, 16
    kernel_size, stride = 2, 2
    H_out, W_out = (H - 1) * stride + kernel_size, (W - 1) * stride + kernel_size

    key = jax.random.PRNGKey(0)
    kx, kh, kw = jax.random.split(key, 3)
    x = jax.random.normal(kx, (N, C, H, W), dtype=jnp.float32)

    # Valid max-pool indices: each (h, w) entry points somewhere inside its own
    # kernel_size x kernel_size window of the output plane.
    dh = jax.random.randint(kh, (N, C, H, W), 0, kernel_size)
    dw = jax.random.randint(kw, (N, C, H, W), 0, kernel_size)
    hh = jnp.arange(H).reshape(1, 1, H, 1) * stride + dh
    ww = jnp.arange(W).reshape(1, 1, 1, W) * stride + dw
    idc = (hh * W_out + ww).astype(jnp.int32)

    model = UpSample(kernel_size, stride=stride)
    out = model(x, idc)
    out = jax.block_until_ready(out)

    # Pure-JAX reference scatter for correctness.
    ref = jnp.zeros((N * C, H_out * W_out), x.dtype)
    ref = ref.at[jnp.arange(N * C)[:, None], idc.reshape(N * C, -1)].set(
        x.reshape(N * C, -1))
    ref = ref.reshape(N, C, H_out, W_out)

    assert out.shape == (N, C, H_out, W_out)
    assert jnp.allclose(out, ref, atol=1e-6), "mismatch vs reference unpool"
    print("KERNEL_OK")
</pallas_src>

<mosaic_0001>
module attributes {stable_mosaic.version = 11 : i64} {
  func.func @_max_unpool_kernel(%arg0: i32, %arg1: memref<64x16xf32, #tpu.memory_space<vmem>>, %arg2: memref<64x16xi32, #tpu.memory_space<vmem>>, %arg3: memref<64x1xi32, #tpu.memory_space<vmem>>, %arg4: memref<64x64xf32, #tpu.memory_space<vmem>>) attributes {dimension_semantics = [#tpu.dimension_semantics<parallel>], iteration_bounds = array<i64: 2>, scalar_prefetch = 0 : i64, scratch_operands = 0 : i64, tpu.core_type = #tpu.core_type<tc>, window_params = [{transform_indices = @transform_0, window_bounds = array<i64: 64, 16>}, {transform_indices = @transform_1, window_bounds = array<i64: 64, 16>}, {transform_indices = @transform_2, window_bounds = array<i64: 64, 1>}, {transform_indices = @transform_3, window_bounds = array<i64: 64, 64>}]} {
    %c0 = arith.constant 0 : index
    %c0_0 = arith.constant 0 : index
    %0 = vector.load %arg1[%c0, %c0_0] : memref<64x16xf32, #tpu.memory_space<vmem>>, vector<64x16xf32>
    %c0_1 = arith.constant 0 : index
    %c0_2 = arith.constant 0 : index
    %1 = vector.load %arg2[%c0_1, %c0_2] : memref<64x16xi32, #tpu.memory_space<vmem>>, vector<64x16xi32>
    %2 = tpu.iota {dimensions = array<i32: 1>} : vector<64x16xi32>
    %c0_3 = arith.constant 0 : index
    %c0_4 = arith.constant 0 : index
    %3 = vector.load %arg3[%c0_3, %c0_4] : memref<64x1xi32, #tpu.memory_space<vmem>>, vector<64x1xi32>
    %c2_i32 = arith.constant 2 : i32
    %4 = vector.broadcast %c2_i32 : i32 to vector<64x16xi32>
    %5 = arith.muli %2, %4 : vector<64x16xi32>
    %6 = vector.broadcast %3 : vector<64x1xi32> to vector<64x16xi32>
    %7 = arith.addi %6, %5 : vector<64x16xi32>
    %8 = tpu.iota {dimensions = array<i32: 0>} : vector<16x32xi32>
    %9 = tpu.iota {dimensions = array<i32: 1>} : vector<16x32xi32>
    %c2_i32_5 = arith.constant 2 : i32
    %10 = vector.broadcast %c2_i32_5 : i32 to vector<16x32xi32>
    %11 = arith.muli %8, %10 : vector<16x32xi32>
    %c0_i32 = arith.constant 0 : i32
    %12 = vector.broadcast %c0_i32 : i32 to vector<16x32xi32>
    %13 = arith.addi %11, %12 : vector<16x32xi32>
    %14 = arith.cmpi eq, %9, %13 : vector<16x32xi32>
    %cst = arith.constant 1.000000e+00 : f32
    %cst_6 = arith.constant 0.000000e+00 : f32
    %15 = vector.broadcast %cst : f32 to vector<16x32xf32>
    %16 = vector.broadcast %cst_6 : f32 to vector<16x32xf32>
    %17 = arith.select %14, %15, %16 : vector<16x32xi1>, vector<16x32xf32>
    %c2_i32_7 = arith.constant 2 : i32
    %18 = vector.broadcast %c2_i32_7 : i32 to vector<16x32xi32>
    %19 = arith.muli %8, %18 : vector<16x32xi32>
    %c1_i32 = arith.constant 1 : i32
    %20 = vector.broadcast %c1_i32 : i32 to vector<16x32xi32>
    %21 = arith.addi %19, %20 : vector<16x32xi32>
    %22 = arith.cmpi eq, %9, %21 : vector<16x32xi32>
    %cst_8 = arith.constant 1.000000e+00 : f32
    %cst_9 = arith.constant 0.000000e+00 : f32
    %23 = vector.broadcast %cst_8 : f32 to vector<16x32xf32>
    %24 = vector.broadcast %cst_9 : f32 to vector<16x32xf32>
    %25 = arith.select %22, %23, %24 : vector<16x32xi1>, vector<16x32xf32>
    %cst_10 = arith.constant 0.000000e+00 : f32
    %26 = vector.broadcast %cst_10 : f32 to vector<64x32xf32>
    %c0_i32_11 = arith.constant 0 : i32
    %27 = vector.broadcast %c0_i32_11 : i32 to vector<64x16xi32>
    %28 = arith.addi %7, %27 : vector<64x16xi32>
    %29 = arith.cmpi eq, %1, %28 : vector<64x16xi32>
    %cst_12 = arith.constant 0.000000e+00 : f32
    %30 = vector.broadcast %cst_12 : f32 to vector<64x16xf32>
    %31 = arith.select %29, %0, %30 : vector<64x16xi1>, vector<64x16xf32>
    %cst_13 = arith.constant dense<0.000000e+00> : vector<64x32xf32>
    %32 = tpu.matmul %31, %17, %cst_13 {dimension_numbers = #tpu.dot_dimension_numbers<[1], [0], [0], [1], [0, 0, 1, 1], [], []>} : vector<64x16xf32>, vector<16x32xf32>, vector<64x32xf32> -> vector<64x32xf32>
    %33 = arith.addf %26, %32 : vector<64x32xf32>
    %c1_i32_14 = arith.constant 1 : i32
    %34 = vector.broadcast %c1_i32_14 : i32 to vector<64x16xi32>
    %35 = arith.addi %7, %34 : vector<64x16xi32>
    %36 = arith.cmpi eq, %1, %35 : vector<64x16xi32>
    %cst_15 = arith.constant 0.000000e+00 : f32
    %37 = vector.broadcast %cst_15 : f32 to vector<64x16xf32>
    %38 = arith.select %36, %0, %37 : vector<64x16xi1>, vector<64x16xf32>
    %cst_16 = arith.constant dense<0.000000e+00> : vector<64x32xf32>
    %39 = tpu.matmul %38, %25, %cst_16 {dimension_numbers = #tpu.dot_dimension_numbers<[1], [0], [0], [1], [0, 0, 1, 1], [], []>} : vector<64x16xf32>, vector<16x32xf32>, vector<64x32xf32> -> vector<64x32xf32>
    %40 = arith.addf %33, %39 : vector<64x32xf32>
    %c0_17 = arith.constant 0 : index
    %c0_18 = arith.constant 0 : index
    %41 = vector.load %arg4[%c0_17, %c0_18] : memref<64x64xf32, #tpu.memory_space<vmem>>, vector<64x32xf32>
    tpu.vector_store %arg4[%c0_17, %c0_18], %40 {strides = array<i32>} : memref<64x64xf32, #tpu.memory_space<vmem>>, vector<64x32xf32>,
    %cst_19 = arith.constant 0.000000e+00 : f32
    %42 = vector.broadcast %cst_19 : f32 to vector<64x32xf32>
    %c32_i32 = arith.constant 32 : i32
    %43 = vector.broadcast %c32_i32 : i32 to vector<64x16xi32>
    %44 = arith.addi %7, %43 : vector<64x16xi32>
    %45 = arith.cmpi eq, %1, %44 : vector<64x16xi32>
    %cst_20 = arith.constant 0.000000e+00 : f32
    %46 = vector.broadcast %cst_20 : f32 to vector<64x16xf32>
    %47 = arith.select %45, %0, %46 : vector<64x16xi1>, vector<64x16xf32>
    %cst_21 = arith.constant dense<0.000000e+00> : vector<64x32xf32>
    %48 = tpu.matmul %47, %17, %cst_21 {dimension_numbers = #tpu.dot_dimension_numbers<[1], [0], [0], [1], [0, 0, 1, 1], [], []>} : vector<64x16xf32>, vector<16x32xf32>, vector<64x32xf32> -> vector<64x32xf32>
    %49 = arith.addf %42, %48 : vector<64x32xf32>
    %c33_i32 = arith.constant 33 : i32
    %50 = vector.broadcast %c33_i32 : i32 to vector<64x16xi32>
    %51 = arith.addi %7, %50 : vector<64x16xi32>
    %52 = arith.cmpi eq, %1, %51 : vector<64x16xi32>
    %cst_22 = arith.constant 0.000000e+00 : f32
    %53 = vector.broadcast %cst_22 : f32 to vector<64x16xf32>
    %54 = arith.select %52, %0, %53 : vector<64x16xi1>, vector<64x16xf32>
    %cst_23 = arith.constant dense<0.000000e+00> : vector<64x32xf32>
    %55 = tpu.matmul %54, %25, %cst_23 {dimension_numbers = #tpu.dot_dimension_numbers<[1], [0], [0], [1], [0, 0, 1, 1], [], []>} : vector<64x16xf32>, vector<16x32xf32>, vector<64x32xf32> -> vector<64x32xf32>
    %56 = arith.addf %49, %55 : vector<64x32xf32>
    %c0_24 = arith.constant 0 : index
    %c32 = arith.constant 32 : index
    %57 = vector.load %arg4[%c0_24, %c32] : memref<64x64xf32, #tpu.memory_space<vmem>>, vector<64x32xf32>
    tpu.vector_store %arg4[%c0_24, %c32], %56 {strides = array<i32>} : memref<64x64xf32, #tpu.memory_space<vmem>>, vector<64x32xf32>,
    return
  }
  func.func @transform_0(%arg0: i32) -> (i32, i32) {
    %c0_i32 = arith.constant 0 : i32
    %c0_i32_0 = arith.constant 0 : i32
    return %arg0, %c0_i32 : i32, i32
  }
  func.func @transform_1(%arg0: i32) -> (i32, i32) {
    %c0_i32 = arith.constant 0 : i32
    %c0_i32_0 = arith.constant 0 : i32
    return %arg0, %c0_i32 : i32, i32
  }
  func.func @transform_2(%arg0: i32) -> (i32, i32) {
    %c0_i32 = arith.constant 0 : i32
    %c0_i32_0 = arith.constant 0 : i32
    return %arg0, %c0_i32 : i32, i32
  }
  func.func @transform_3(%arg0: i32) -> (i32, i32) {
    %c0_i32 = arith.constant 0 : i32
    %c0_i32_0 = arith.constant 0 : i32
    return %arg0, %c0_i32 : i32, i32
  }
}

</mosaic_0001>

<bundles_post_ra>
// kernel: tpu_custom_call.1
= control target key start
LH: loop header
LB: loop body
LE: loop exit
PB: predicated region body
PF: predicated region fallthrough
CT: control target
= control target key end

     0   :  { %s1262_s12 = smov 0   ;;  %s1533_s0 = inlined_call_operand.vmem [shape: f32[128,16], index: 0, kind: input, shape index: {}]   ;;  %s1534_s1 = inlined_call_operand.vmem [shape: s32[128,16], index: 1, kind: input, shape index: {}]   ;;  %s1535_s2 = inlined_call_operand.vmem [shape: s32[128,1], index: 2, kind: input, shape index: {}]   ;;  %s1536_s3 = inlined_call_operand.vmem [shape: f32[128,64], index: 3, kind: output, shape index: {}]  }
   0x1 LB: > { %s1027_s13 = sadd.s32 4294967295, %s1237_s12   ;;  %p1031_p0 = scmp.ge.s32.totalorder %s1237_s12, 1  ;;  %s1237_s12 = sphi %s1262_s12, %s13_s12  }
   0x2   : > { %p160_p1 = scmp.lt.s32.totalorder %s1237_s12, 3 }
   0x4   : > { %p161_p2 = pnand %p1031_p0, %p160_p1 }
   0x5   : > { %s1032_s14 = sshll.u32 (!%p161_p2), %s1027_s13, 3  ;;  %v234_v0 = vlaneseq (!%p161_p2)  ;;  %v1239_v1 = vmov (!%p161_p2), 0   ;;  %v1240_v15 = vmov (!%p161_p2), 1.0|1.0   ;;  %vm332_vm6 = vcmask (!%p161_p2), 130048   ;;  %s1241_s28 = smov (!%p161_p2), 32  }
   0x6   : > { %164 = sbr.rel (%p161_p2) target bundleno = 512 (0x200), region = 32  ;;  %1230 = vset.pattern.permute.xlu1 (!%p161_p2), %v1239_v1  ;;  %1229 = vset.pattern.permute.xlu0 (!%p161_p2), %v1239_v1  ;;  %p195_p3 = scmp.lt.s32.totalorder (!%p161_p2), %s1032_s14, 15 }
   0x7   : > { %v278_v2 = vshrl.u32 (!%p161_p2), %v234_v0, 7  ;;  %v235_v10 = vand.u32 (!%p161_p2), 127, %v234_v0 }
   0x9   : > { %v279_v3 = vadd.s32 (!%p161_p2), 8, %v278_v2  ;;  %v280_v6 = vmul.u32 (!%p161_p2), 2, %v278_v2  ;;  %v1290_v19 = vmul.u32 (!%p161_p2), 2, %v235_v10 }
   0xb   : > { %v281_v7 = vmul.u32 (!%p161_p2), 2, %v279_v3  ;;  %v286_v11 = vadd.s32 (!%p161_p2), 1, %v280_v6  ;;  %vm282_vm3 = vcmp.eq.s32.totalorder (!%p161_p2), %v235_v10, %v280_v6 }
   0xd   : > { %s1540_s14 = smov (!%p195_p3, %s1032_s14), 15  ;;  %v287_v12 = vadd.s32 1, %v281_v7  ;;  %vm288_vm0 = vcmp.eq.s32.totalorder %v235_v10, %v286_v11  ;;  %vm283_vm4 = vcmp.eq.s32.totalorder %v235_v10, %v281_v7 }
   0xe   : > { %s1270_s15 = sshll.u32 %s1540_s14, 3  ;;  %vm1280_vm5 = vmpackc.low %vm283_vm4, %vm282_vm3 }
   0xf   : > { %s210_s18 = scalar_lea.vmem %s1535_s2, %s1270_s15  ;;  %vm289_vm1 = vcmp.eq.s32.totalorder %v235_v10, %v287_v12  ;;  %s1296_s21 = scalar_lea.vmem %s1534_s1, %s1270_s15 }
  0x10   : > { %v238_v4 = vld [vmem:[%s210_s18 + $0x10] sm:$0xff]  ;;  %v236_v5 = vld [vmem:[%s210_s18] sm:$0xff]  ;;  %v239_v8 = vld [vmem:[%s210_s18 + $0x18] sm:$0xff]  ;;  %s1314_s24 = scalar_lea.vmem %s1533_s0, %s1270_s15  ;;  %s1496_s27 = scalar_lea.vmem %s1536_s3, %s1270_s15 }
  0x11   : > { %252 = vperm.xlu1 %1230, %v238_v4   ;;  %246 = vperm.xlu0 %1229, %v236_v5   ;;  %v237_v9 = vld [vmem:[%s210_s18 + $0x8] sm:$0xff]  ;;  %v240_v14 = vld [vmem:[%s210_s18 + $0x20] sm:$0xff]  ;;  %vm1186_vm2 = vmpackc.low %vm289_vm1, %vm288_vm0 }
  0x12   : > { %v241_v13 = vld [vmem:[%s210_s18 + $0x28] sm:$0xff]  ;;  %1195 = vmatprep.subr.msk.bf16.mxu1 %vm1186_vm2, %v1240_v15  ;;  %1187 = vmatprep.subr.msk.bf16.mxu0 %vm1186_vm2, %v1240_v15  ;;  %v243_v16 = vld [vmem:[%s210_s18 + $0x38] sm:$0xff]  ;;  %v242_v17 = vld [vmem:[%s210_s18 + $0x30] sm:$0xff] }
  0x13   : > { %1197 = vmatpush3.bf16.msk.msra.mxu1 %vm1186_vm2, %v1240_v15  ;;  %1189 = vmatpush3.bf16.msk.msra.mxu0 %vm1186_vm2, %v1240_v15  ;;  %v1305_v24 = vld [vmem:[%s1296_s21] sm:$0xff]  ;;  %v1308_v25 = vld [vmem:[%s1296_s21 + $0x10] sm:$0xff]  ;;  %v1321_v32 = vld [vmem:[%s1296_s21 + $0x8] sm:$0xff] }
  0x14   : > { %1199 = vmatprep.subr.msk.bf16.mxu1 %vm1280_vm5, %v1240_v15  ;;  %1191 = vmatprep.subr.msk.bf16.mxu0 %vm1280_vm5, %v1240_v15  ;;  %v1340_v37 = vld [vmem:[%s1314_s24] sm:$0xff]  ;;  %v1358_v43 = vld [vmem:[%s1314_s24 + $0x10] sm:$0xff]  ;;  %v1371_v52 = vld [vmem:[%s1314_s24 + $0x8] sm:$0xff] }
  0x15   : > { %255 = vperm.xlu1 %1230, %v239_v8   ;;  %249 = vperm.xlu0 %1229, %v237_v9   ;;  %v1376_v53 = vld [vmem:[%s1296_s21 + $0x18] sm:$0xff]  ;;  %v1396_v63 = vld [vmem:[%s1296_s21 + $0x20] sm:$0xff]  ;;  %v1417_v6 = vld [vmem:[%s1296_s21 + $0x28] sm:$0xff] }
  0x16   : > { %v1381_v56 = vld [vmem:[%s1314_s24 + $0x18] sm:$0xff]  ;;  %v222_v5 = vld [vmem:[%s1314_s24 + $0x20] sm:$0xff]  ;;  %v223_v9 = vld [vmem:[%s1314_s24 + $0x28] sm:$0xff] }
  0x19   : > { %261 = vperm.xlu1 %1230, %v241_v13   ;;  %258 = vperm.xlu0 %1229, %v240_v14   ;;  %v232_v14 = vld [vmem:[%s1296_s21 + $0x30] sm:$0xff] }
  0x1d   : > { %267 = vperm.xlu1 %1230, %v243_v16   ;;  %264 = vperm.xlu0 %1229, %v242_v17  }
  0x90   : > { %v253_v20 = vpop.permute.xlu1 %252  ;;  %v247_v21 = vpop.permute.xlu0 %246 }
  0x91   : > { %v1299_v22 = vadd.s32 %v253_v20, %v1290_v19  ;;  %v1302_v23 = vadd.s32 %v247_v21, %v1290_v19  ;;  %v233_v20 = vld [vmem:[%s1296_s21 + $0x38] sm:$0xff] }
  0x93   : > { %v308_v26 = vadd.s32 1, %v1302_v23  ;;  %v624_v27 = vadd.s32 33, %v1302_v23  ;;  %v310_v28 = vadd.s32 1, %v1299_v22  ;;  %v626_v29 = vadd.s32 33, %v1299_v22 }
  0x94   : > { %v256_v30 = vpop.permute.xlu1 %255  ;;  %v250_v31 = vpop.permute.xlu0 %249  ;;  %vm292_vm7 = vcmp.eq.s32.totalorder %v1305_v24, %v1302_v23  ;;  %v1326_v33 = vadd.s32 32, %v1302_v23  ;;  %vm294_vm8 = vcmp.eq.s32.totalorder %v1308_v25, %v1299_v22  ;;  %v1331_v34 = vadd.s32 32, %v1299_v22 }
  0x95   : > { %v1334_v35 = vadd.s32 %v256_v30, %v1290_v19  ;;  %v1337_v36 = vadd.s32 %v250_v31, %v1290_v19  ;;  %vm316_vm9 = vcmp.eq.s32.totalorder %v1305_v24, %v308_v26  ;;  %vm632_vm10 = vcmp.eq.s32.totalorder %v1305_v24, %v624_v27  ;;  %v225_v26 = vld [vmem:[%s1314_s24 + $0x38] sm:$0xff] }
  0x96   : > { %v324_v38 = vsel %vm316_vm9, %v1340_v37, 0.0  ;;  %v640_v39 = vsel %vm632_vm10, %v1340_v37, 0.0  ;;  %vm318_vm11 = vcmp.eq.s32.totalorder %v1308_v25, %v310_v28  ;;  %vm634_vm12 = vcmp.eq.s32.totalorder %v1308_v25, %v626_v29 }
  0x97   : > { %vm293_vm13 = vcmp.eq.s32.totalorder %v1321_v32, %v1337_v36  ;;  %v1351_v40 = vadd.s32 32, %v1337_v36  ;;  %1126 = vmatprep.mubr.msk.f32.mxu0 %vm332_vm6, %v324_v38  ;;  %1158 = vmatprep.mubr.msk.f32.mxu1 %vm332_vm6, %v640_v39  ;;  %v309_v41 = vadd.s32 1, %v1337_v36  ;;  %v625_v42 = vadd.s32 33, %v1337_v36 }
  0x98   : > { %v262_v44 = vpop.permute.xlu1 %261  ;;  %v259_v45 = vpop.permute.xlu0 %258  ;;  %v326_v46 = vsel %vm318_vm11, %v1358_v43, 0.0  ;;  %v642_v47 = vsel %vm634_vm12, %v1358_v43, 0.0  ;;  %v311_v48 = vadd.s32 1, %v1334_v35  ;;  %v627_v49 = vadd.s32 33, %v1334_v35 }
  0x99   : > { %v1365_v50 = vadd.s32 %v262_v44, %v1290_v19  ;;  %v1368_v51 = vadd.s32 %v259_v45, %v1290_v19  ;;  %vm317_vm14 = vcmp.eq.s32.totalorder %v1321_v32, %v309_v41  ;;  %vm633_vm15 = vcmp.eq.s32.totalorder %v1321_v32, %v625_v42 }
  0x9a   : > { %v325_v54 = vsel %vm317_vm14, %v1371_v52, 0.0  ;;  %v641_v55 = vsel %vm633_vm15, %v1371_v52, 0.0  ;;  %vm319_vm0 = vcmp.eq.s32.totalorder %v1376_v53, %v311_v48  ;;  %vm635_vm1 = vcmp.eq.s32.totalorder %v1376_v53, %v627_v49 }
  0x9b   : > { %1127 = vmatmul.mubr.msk.f32.vlgmr.msra.gmra.mrb[0].mxu0 %vm332_vm6, %v325_v54  ;;  %1159 = vmatmul.mubr.msk.f32.vlgmr.msra.gmra.mrb[0].mxu1 %vm332_vm6, %v641_v55  ;;  %v327_v57 = vsel %vm319_vm0, %v1381_v56, 0.0  ;;  %v643_v58 = vsel %vm635_vm1, %v1381_v56, 0.0  ;;  %v312_v59 = vadd.s32 1, %v1368_v51  ;;  %v628_v60 = vadd.s32 33, %v1368_v51 }
  0x9c   : > { %1201 = vmatpush3.bf16.msk.msra.mxu1 %vm1280_vm5, %v1240_v15  ;;  %v268_v61 = vpop.permute.xlu1 %267  ;;  %v265_v62 = vpop.permute.xlu0 %264  ;;  %1129 = vmatprep.mubr.msk.f32.mxu0 %vm332_vm6, %v326_v46  ;;  %v313_v0 = vadd.s32 1, %v1365_v50  ;;  %v629_v1 = vadd.s32 33, %v1365_v50  ;;  %v1404_v2 = vsel %vm292_vm7, %v1340_v37, 0.0  ;;  %vm608_vm2 = vcmp.eq.s32.totalorder %v1305_v24, %v1326_v33 }
  0x9d   : > { %v1409_v3 = vadd.s32 %v268_v61, %v1290_v19  ;;  %v275_v4 = vadd.s32 %v265_v62, %v1290_v19  ;;  %1161 = vmatprep.mubr.msk.f32.mxu1 %vm332_vm6, %v642_v47  ;;  %vm320_vm3 = vcmp.eq.s32.totalorder %v1396_v63, %v312_v59  ;;  %vm636_vm4 = vcmp.eq.s32.totalorder %v1396_v63, %v628_v60  ;;  %v224_v19 = vld [vmem:[%s1314_s24 + $0x30] sm:$0xff] }
  0x9e   : > { %v328_v7 = vsel %vm320_vm3, %v222_v5, 0.0  ;;  %v644_v8 = vsel %vm636_vm4, %v222_v5, 0.0  ;;  %vm321_vm7 = vcmp.eq.s32.totalorder %v1417_v6, %v313_v0  ;;  %vm637_vm9 = vcmp.eq.s32.totalorder %v1417_v6, %v629_v1  ;;  %1193 = vmatpush3.bf16.msk.msra.mxu0 %vm1280_vm5, %v1240_v15 }
  0x9f   : > { %1130 = vmatmul.mubr.msk.f32.gmra.mrb[2].mxu0 %vm332_vm6, %v327_v57  ;;  %1162 = vmatmul.mubr.msk.f32.gmra.mrb[2].mxu1 %vm332_vm6, %v643_v58  ;;  %v329_v10 = vsel %vm321_vm7, %v223_v9, 0.0  ;;  %v645_v11 = vsel %vm637_vm9, %v223_v9, 0.0  ;;  %v314_v12 = vadd.s32 1, %v275_v4  ;;  %v630_v13 = vadd.s32 33, %v275_v4 }
  0xa0   : > { %1132 = vmatprep.mubr.msk.f32.mxu0 %vm332_vm6, %v328_v7  ;;  %1164 = vmatprep.mubr.msk.f32.mxu1 %vm332_vm6, %v644_v8  ;;  %v315_v16 = vadd.s32 1, %v1409_v3  ;;  %v631_v17 = vadd.s32 33, %v1409_v3  ;;  %v616_v15 = vsel %vm608_vm2, %v1340_v37, 0.0  ;;  %v301_v18 = vsel %vm293_vm13, %v1371_v52, 0.0 }
  0xa1   : > { %vm322_vm5 = vcmp.eq.s32.totalorder %v232_v14, %v314_v12  ;;  %vm638_vm10 = vcmp.eq.s32.totalorder %v232_v14, %v630_v13  ;;  %vm609_vm11 = vcmp.eq.s32.totalorder %v1321_v32, %v1351_v40  ;;  %v302_v21 = vsel %vm294_vm8, %v1358_v43, 0.0 }
  0xa2   : > { %v330_v23 = vsel %vm322_vm5, %v224_v19, 0.0  ;;  %v646_v24 = vsel %vm638_vm10, %v224_v19, 0.0  ;;  %vm323_vm12 = vcmp.eq.s32.totalorder %v233_v20, %v315_v16  ;;  %vm639_vm14 = vcmp.eq.s32.totalorder %v233_v20, %v631_v17 }
  0xa3   : > { %1133 = vmatmul.mubr.msk.f32.gmra.mrb[4].mxu0 %vm332_vm6, %v329_v10  ;;  %1165 = vmatmul.mubr.msk.f32.gmra.mrb[4].mxu1 %vm332_vm6, %v645_v11  ;;  %v331_v27 = vsel %vm323_vm12, %v225_v26, 0.0  ;;  %v647_v28 = vsel %vm639_vm14, %v225_v26, 0.0  ;;  %v617_v29 = vsel %vm609_vm11, %v1371_v52, 0.0  ;;  %vm610_vm13 = vcmp.eq.s32.totalorder %v1308_v25, %v1331_v34 }
  0xa4   : > { %1135 = vmatprep.mubr.msk.f32.mxu0 %vm332_vm6, %v330_v23  ;;  %1167 = vmatprep.mubr.msk.f32.mxu1 %vm332_vm6, %v646_v24  ;;  %v618_v22 = vsel %vm610_vm13, %v1358_v43, 0.0  ;;  %vm295_vm8 = vcmp.eq.s32.totalorder %v1376_v53, %v1334_v35  ;;  %v603_v30 = vadd.s32 32, %v1334_v35  ;;  %vm296_vm15 = vcmp.eq.s32.totalorder %v1396_v63, %v1368_v51 }
  0xa5   : > { %v303_v31 = vsel %vm295_vm8, %v1381_v56, 0.0  ;;  %v304_v32 = vsel %vm296_vm15, %v222_v5, 0.0  ;;  %v604_v33 = vadd.s32 32, %v1368_v51  ;;  %vm297_vm0 = vcmp.eq.s32.totalorder %v1417_v6, %v1365_v50 }
  0xa6   : > { %vm611_vm1 = vcmp.eq.s32.totalorder %v1376_v53, %v603_v30  ;;  %v305_v25 = vsel %vm297_vm0, %v223_v9, 0.0  ;;  %v605_v34 = vadd.s32 32, %v1365_v50  ;;  %vm298_vm2 = vcmp.eq.s32.totalorder %v232_v14, %v275_v4 }
  0xa7   : > { %1136 = vmatmul.mubr.msk.f32.gmra.mrb[6].mxu0 %vm332_vm6, %v331_v27  ;;  %1168 = vmatmul.mubr.msk.f32.gmra.mrb[6].mxu1 %vm332_vm6, %v647_v28  ;;  %v619_v35 = vsel %vm611_vm1, %v1381_v56, 0.0  ;;  %vm612_vm3 = vcmp.eq.s32.totalorder %v1396_v63, %v604_v33  ;;  %v306_v36 = vsel %vm298_vm2, %v224_v19, 0.0  ;;  %v606_v37 = vadd.s32 32, %v275_v4 }
  0xa8   : > { %1142 = vmatprep.mubr.msk.f32.mxu0 %vm332_vm6, %v1404_v2  ;;  %1174 = vmatprep.mubr.msk.f32.mxu1 %vm332_vm6, %v616_v15  ;;  %v620_v38 = vsel %vm612_vm3, %v222_v5, 0.0  ;;  %vm613_vm4 = vcmp.eq.s32.totalorder %v1417_v6, %v605_v34  ;;  %vm299_vm7 = vcmp.eq.s32.totalorder %v233_v20, %v1409_v3  ;;  %v607_v39 = vadd.s32 32, %v1409_v3 }
  0xa9   : > { %v621_v40 = vsel %vm613_vm4, %v223_v9, 0.0  ;;  %vm614_vm9 = vcmp.eq.s32.totalorder %v232_v14, %v606_v37  ;;  %v307_v41 = vsel %vm299_vm7, %v225_v26, 0.0  ;;  %vm591_vm10 = vcmask 261120  }
  0xaa   : > { %v622_v42 = vsel %vm614_vm9, %v224_v19, 0.0  ;;  %vm615_vm5 = vcmp.eq.s32.totalorder %v233_v20, %v607_v39 }
  0xab   : > { %1143 = vmatmul.mubr.msk.f32.vlgmr.msra.gmra.mrb[0].mxu0 %vm332_vm6, %v301_v18  ;;  %1175 = vmatmul.mubr.msk.f32.vlgmr.msra.gmra.mrb[0].mxu1 %vm332_vm6, %v617_v29  ;;  %v623_v43 = vsel %vm615_vm5, %v225_v26, 0.0 }
  0xac   : > { %1145 = vmatprep.mubr.msk.f32.mxu0 %vm332_vm6, %v302_v21  ;;  %1177 = vmatprep.mubr.msk.f32.mxu1 %vm332_vm6, %v618_v22 }
  0xaf   : > { %1146 = vmatmul.mubr.msk.f32.gmra.mrb[2].mxu0 %vm332_vm6, %v303_v31  ;;  %1178 = vmatmul.mubr.msk.f32.gmra.mrb[2].mxu1 %vm332_vm6, %v619_v35 }
  0xb0   : > { %1148 = vmatprep.mubr.msk.f32.mxu0 %vm332_vm6, %v304_v32  ;;  %1180 = vmatprep.mubr.msk.f32.mxu1 %vm332_vm6, %v620_v38 }
  0xb3   : > { %1149 = vmatmul.mubr.msk.f32.gmra.mrb[4].mxu0 %vm332_vm6, %v305_v25  ;;  %1181 = vmatmul.mubr.msk.f32.gmra.mrb[4].mxu1 %vm332_vm6, %v621_v40 }
  0xb4   : > { %1151 = vmatprep.mubr.msk.f32.mxu0 %vm332_vm6, %v306_v36  ;;  %1183 = vmatprep.mubr.msk.f32.mxu1 %vm332_vm6, %v622_v42 }
  0xb7   : > { %1152 = vmatmul.mubr.msk.f32.gmra.mrb[6].mxu0 %vm332_vm6, %v307_v41  ;;  %1184 = vmatmul.mubr.msk.f32.gmra.mrb[6].mxu1 %vm332_vm6, %v623_v43  ;;  %vm938_vm6 = vcmask 523520  }
 0x17e   : > { %v1144_v44 = vpop.f32.mrb[0].mxu0  ;;  %v1176_v45 = vpop.f32.mrb[0].mxu1 }
 0x17f   : > { %593 = vst.msk [vmem:[%s1496_s27 + $0x8] sm:$0xff] %vm591_vm10, %v1144_v44  ;;  %916 = vrot.lane.b32.xlu1 %v1176_v45, %s1241_s28  ;;  %v552_v46 = vpop.f32.mrb[1].mxu0  ;;  %v867_v47 = vpop.f32.mrb[1].mxu1 }
 0x180   : > { %592 = vst.msk [vmem:[%s1496_s27] sm:$0xff] %vm591_vm10, %v552_v46  ;;  %914 = vrot.lane.b32.xlu0 %v867_v47, %s1241_s28 }
 0x182   : > { %v1147_v48 = vpop.f32.mrb[2].mxu0  ;;  %v1179_v49 = vpop.f32.mrb[2].mxu1 }
 0x183   : > { %595 = vst.msk [vmem:[%s1496_s27 + $0x18] sm:$0xff] %vm591_vm10, %v1147_v48  ;;  %920 = vrot.lane.b32.xlu1 %v1179_v49, %s1241_s28  ;;  %v562_v50 = vpop.f32.mrb[3].mxu0  ;;  %v877_v51 = vpop.f32.mrb[3].mxu1 }
 0x184   : > { %594 = vst.msk [vmem:[%s1496_s27 + $0x10] sm:$0xff] %vm591_vm10, %v562_v50  ;;  %918 = vrot.lane.b32.xlu0 %v877_v51, %s1241_s28 }
 0x186   : > { %v1150_v52 = vpop.f32.mrb[4].mxu0  ;;  %v1182_v53 = vpop.f32.mrb[4].mxu1 }
 0x187   : > { %597 = vst.msk [vmem:[%s1496_s27 + $0x28] sm:$0xff] %vm591_vm10, %v1150_v52  ;;  %924 = vrot.lane.b32.xlu1 %v1182_v53, %s1241_s28  ;;  %v572_v54 = vpop.f32.mrb[5].mxu0  ;;  %v887_v55 = vpop.f32.mrb[5].mxu1 }
 0x188   : > { %596 = vst.msk [vmem:[%s1496_s27 + $0x20] sm:$0xff] %vm591_vm10, %v572_v54  ;;  %922 = vrot.lane.b32.xlu0 %v887_v55, %s1241_s28 }
 0x18a   : > { %v1153_v56 = vpop.f32.mrb[6].mxu0  ;;  %v1185_v57 = vpop.f32.mrb[6].mxu1 }
 0x18b   : > { %599 = vst.msk [vmem:[%s1496_s27 + $0x38] sm:$0xff] %vm591_vm10, %v1153_v56  ;;  %928 = vrot.lane.b32.xlu1 %v1185_v57, %s1241_s28  ;;  %v582_v58 = vpop.f32.mrb[7].mxu0  ;;  %v897_v59 = vpop.f32.mrb[7].mxu1 }
 0x18c   : > { %598 = vst.msk [vmem:[%s1496_s27 + $0x30] sm:$0xff] %vm591_vm10, %v582_v58  ;;  %926 = vrot.lane.b32.xlu0 %v897_v59, %s1241_s28 }
 0x1f1   : > { %v917_v60 = vpop.permute.xlu1 %916 }
 0x1f2   : > { %940 = vst.msk [vmem:[%s1496_s27 + $0x8] sm:$0xff] %vm938_vm6, %v917_v60  ;;  %v915_v61 = vpop.permute.xlu0 %914 }
 0x1f3   : > { %939 = vst.msk [vmem:[%s1496_s27] sm:$0xff] %vm938_vm6, %v915_v61 }
 0x1f5   : > { %v921_v62 = vpop.permute.xlu1 %920 }
 0x1f6   : > { %942 = vst.msk [vmem:[%s1496_s27 + $0x18] sm:$0xff] %vm938_vm6, %v921_v62  ;;  %v919_v63 = vpop.permute.xlu0 %918 }
 0x1f7   : > { %941 = vst.msk [vmem:[%s1496_s27 + $0x10] sm:$0xff] %vm938_vm6, %v919_v63 }
 0x1f9   : > { %v925_v0 = vpop.permute.xlu1 %924 }
 0x1fa   : > { %944 = vst.msk [vmem:[%s1496_s27 + $0x28] sm:$0xff] %vm938_vm6, %v925_v0  ;;  %v923_v1 = vpop.permute.xlu0 %922 }
 0x1fb   : > { %943 = vst.msk [vmem:[%s1496_s27 + $0x20] sm:$0xff] %vm938_vm6, %v923_v1 }
 0x1fd   : > { %v929_v2 = vpop.permute.xlu1 %928 }
 0x1fe   : > { %946 = vst.msk [vmem:[%s1496_s27 + $0x38] sm:$0xff] %vm938_vm6, %v929_v2  ;;  %v927_v3 = vpop.permute.xlu0 %926 }
 0x1ff   : > { %945 = vst.msk [vmem:[%s1496_s27 + $0x30] sm:$0xff] %vm938_vm6, %v927_v3 }
 0x200 PF: > { %s13_s12 = sadd.s32 1, %s1237_s12  }
 0x201   : > { %p10_p4 = scmp.ge.s32.totalorder %s13_s12, 4  }
 0x203   :  { %12 = sbr.rel (!%p10_p4) target bundleno = 1 (0x1), region = 68 }

</bundles_post_ra>
